<compile_context>
chip_gen: v6e
topology: v6e:2x2x1
jax: 0.10.0
libtpu: 0.0.40
codegen_flags: <defaults>
</compile_context>

<pallas_src>
import functools

import jax
import jax.numpy as jnp
from jax.experimental import pallas as pl
from jax.experimental.pallas import tpu as pltpu


def _round_up(x, m):
    return (x + m - 1) // m * m


def _pad2(a, rows, cols):
    return jnp.pad(a, ((0, rows - a.shape[0]), (0, cols - a.shape[1])))


def rnn_fused_kernel(inp0_ref, hid0_ref, wxz_ref, wzz_ref, wzx_ref,
                     bz_ref, bx_ref, out_ref, newh_ref, hid_scr, inp_scr):
    """One (batch_tile, time_step) grid point of the fused rollout."""
    t = pl.program_id(1)

    # Load the externally supplied input / hidden state only on the first step
    # of each batch tile; afterwards the recurrence lives in VMEM scratch.
    @pl.when(t == 0)
    def _init():
        hid_scr[...] = hid0_ref[...]
        inp_scr[...] = inp0_ref[...]

    # bf16 operands for the MXU (weights are already bf16 in VMEM); f32 accumulate.
    x_bf = inp_scr[...].astype(jnp.bfloat16)
    h_bf = hid_scr[...].astype(jnp.bfloat16)

    pre = (jnp.dot(x_bf, wxz_ref[...], preferred_element_type=jnp.float32)
           + jnp.dot(h_bf, wzz_ref[...], preferred_element_type=jnp.float32)
           + bz_ref[...])                          # (Bt, Hp) + (1, Hp) broadcast
    new_h = jnp.tanh(pre)                          # f32 epilogue (EUP)

    out = (jnp.dot(new_h.astype(jnp.bfloat16), wzx_ref[...],
                   preferred_element_type=jnp.float32)
           + bx_ref[...])                          # (Bt, Ip) + (1, Ip) broadcast

    # Carry the recurrent state for the next time step in f32.
    hid_scr[...] = new_h
    inp_scr[...] = out

    # Per-step prediction (leading T dim of the output block is squeezed).
    out_ref[...] = out

    # Final hidden state: write once at the last step of this batch tile.
    @pl.when(t == pl.num_programs(1) - 1)
    def _finalize():
        newh_ref[...] = new_h


@functools.partial(jax.jit, static_argnames=("T", "batch_tile"))
def rnn_rollout(inp, hidden, w_xz, w_zz, w_zx, b_z, b_x, *, T, batch_tile=256):
    """Runs T fused RNN steps (output_t becomes input_{t+1}) in one pallas_call.

    Returns (outputs[T, B, input_size], final_hidden[B, hidden_size]).
    T=1 reproduces the module's forward() exactly.
    """
    B, I = inp.shape
    H = hidden.shape[1]
    assert w_xz.shape == (I, H) and w_zz.shape == (H, H) and w_zx.shape == (H, I)

    # (8, 128)-aligned padded sizes -> lane-dense tiles, no masked partial stores.
    Ip = _round_up(I, 128)
    Hp = _round_up(H, 128)
    B8 = _round_up(B, 8)
    Bt = B8 if B8 <= batch_tile else batch_tile
    Bp = _round_up(B8, Bt)
    nb = Bp // Bt

    # One-time padding / bf16 weight cast (amortized over all T steps).
    inp_p = _pad2(inp.astype(jnp.float32), Bp, Ip)
    hid_p = _pad2(hidden.astype(jnp.float32), Bp, Hp)
    wxz_p = _pad2(w_xz.astype(jnp.float32), Ip, Hp).astype(jnp.bfloat16)
    wzz_p = _pad2(w_zz.astype(jnp.float32), Hp, Hp).astype(jnp.bfloat16)
    wzx_p = _pad2(w_zx.astype(jnp.float32), Hp, Ip).astype(jnp.bfloat16)
    bz_p = _pad2(b_z.reshape(1, H).astype(jnp.float32), 1, Hp)
    bx_p = _pad2(b_x.reshape(1, I).astype(jnp.float32), 1, Ip)

    # Explicit VMEM budget (resident bf16 weights + double-buffered blocks +
    # scratch) with headroom; stays well under v7x's 64 MiB physical VMEM.
    vmem_bytes = (2 * 2 * (Ip * Hp + Hp * Hp + Hp * Ip)   # bf16 weights, x2 bufs
                  + 2 * 4 * (Hp + Ip)                     # biases
                  + 2 * 2 * 4 * Bt * (Ip + Hp)            # input blocks, x2 bufs
                  + 2 * 2 * 4 * Bt * (Ip + Hp)            # output blocks, x2 bufs
                  + 4 * Bt * (Ip + Hp))                   # scratch carries
    vmem_limit = int(min(max(vmem_bytes + (4 << 20), 8 << 20), 48 << 20))

    grid_spec = pltpu.PrefetchScalarGridSpec(
        num_scalar_prefetch=0,
        grid=(nb, T),
        in_specs=[
            pl.BlockSpec((Bt, Ip), lambda b, t: (b, 0)),   # initial input
            pl.BlockSpec((Bt, Hp), lambda b, t: (b, 0)),   # initial hidden
            pl.BlockSpec((Ip, Hp), lambda b, t: (0, 0)),   # w_xz (resident)
            pl.BlockSpec((Hp, Hp), lambda b, t: (0, 0)),   # w_zz (resident)
            pl.BlockSpec((Hp, Ip), lambda b, t: (0, 0)),   # w_zx (resident)
            pl.BlockSpec((1, Hp), lambda b, t: (0, 0)),    # b_z  (resident)
            pl.BlockSpec((1, Ip), lambda b, t: (0, 0)),    # b_x  (resident)
        ],
        out_specs=(
            pl.BlockSpec((None, Bt, Ip), lambda b, t: (t, b, 0)),  # per-step outputs
            pl.BlockSpec((Bt, Hp), lambda b, t: (b, 0)),           # final hidden
        ),
        scratch_shapes=[
            pltpu.VMEM((Bt, Hp), jnp.float32),   # hidden carry
            pltpu.VMEM((Bt, Ip), jnp.float32),   # input (fed-back output) carry
        ],
    )

    outputs, new_hidden = pl.pallas_call(
        rnn_fused_kernel,
        out_shape=(jax.ShapeDtypeStruct((T, Bp, Ip), jnp.float32),
                   jax.ShapeDtypeStruct((Bp, Hp), jnp.float32)),
        grid_spec=grid_spec,
        compiler_params=pltpu.CompilerParams(
            dimension_semantics=("parallel", "arbitrary"),
            vmem_limit_bytes=vmem_limit),
    )(inp_p, hid_p, wxz_p, wzz_p, wzx_p, bz_p, bx_p)

    return outputs[:, :B, :I], new_hidden[:B, :H]


def rnn_forward(inp, hidden, w_xz, w_zz, w_zx, b_z, b_x):
    """Pallas equivalent of RNN.forward. Returns (output, new_hidden)."""
    outs, new_h = rnn_rollout(inp, hidden, w_xz, w_zz, w_zx, b_z, b_x, T=1)
    return outs[0], new_h


def init_params(key, input_size, hidden_size, init="Normal"):
    """Parameter init mirroring RNN.init_weights shapes ('Normal' path)."""
    if init != "Normal":
        # TODO(synk): 'Uniform'/'Orthogonal' init variants not reproduced; Normal only.
        pass
    k1, k2, k3, k4, k5 = jax.random.split(key, 5)
    w_xz = jax.random.normal(k1, (input_size, hidden_size), jnp.float32)
    w_zz = jax.random.normal(k2, (hidden_size, hidden_size), jnp.float32)
    w_zx = jax.random.normal(k3, (hidden_size, input_size), jnp.float32)
    b_z = jax.random.normal(k4, (hidden_size,), jnp.float32)
    b_x = jax.random.normal(k5, (input_size,), jnp.float32)
    return w_xz, w_zz, w_zx, b_z, b_x


# ---------------- pure-JAX references for validation ----------------

def ref_forward_f32(inp, hidden, w_xz, w_zz, w_zx, b_z, b_x):
    h = jnp.tanh(inp @ w_xz + hidden @ w_zz + b_z)
    return h @ w_zx + b_x, h


def ref_forward_matched(inp, hidden, w_xz, w_zz, w_zx, b_z, b_x):
    """Same numerics as the kernel: bf16 MXU operands, f32 accumulation/epilogue."""
    bf, f32 = jnp.bfloat16, jnp.float32
    h = jnp.tanh(
        jnp.dot(inp.astype(bf), w_xz.astype(bf), preferred_element_type=f32)
        + jnp.dot(hidden.astype(bf), w_zz.astype(bf), preferred_element_type=f32)
        + b_z)
    o = jnp.dot(h.astype(bf), w_zx.astype(bf), preferred_element_type=f32) + b_x
    return o, h


def ref_rollout_matched(inp, hidden, w_xz, w_zz, w_zx, b_z, b_x, T):
    outs, x, h = [], inp, hidden
    for _ in range(T):
        o, h = ref_forward_matched(x, h, w_xz, w_zz, w_zx, b_z, b_x)
        outs.append(o)
        x = o
    return jnp.stack(outs), h


if __name__ == "__main__":
    B = 2
    INPUT_SIZE = 16
    HIDDEN_SIZE = 32
    T = 4

    key = jax.random.PRNGKey(0)
    kp, kx = jax.random.split(key)
    w_xz, w_zz, w_zx, b_z, b_x = init_params(kp, INPUT_SIZE, HIDDEN_SIZE, init="Normal")
    inp = jax.random.normal(kx, (B, INPUT_SIZE), jnp.float32)
    hidden = jnp.zeros((B, HIDDEN_SIZE), jnp.float32)   # matches get_prediction init

    # --- single step: the module's forward() semantics ---
    out, new_h = rnn_forward(inp, hidden, w_xz, w_zz, w_zx, b_z, b_x)
    jax.block_until_ready((out, new_h))
    assert out.shape == (B, INPUT_SIZE) and new_h.shape == (B, HIDDEN_SIZE)

    # Tight check vs a precision-matched reference (bf16 operands, f32 accum).
    ref_o_m, ref_h_m = ref_forward_matched(inp, hidden, w_xz, w_zz, w_zx, b_z, b_x)
    assert jnp.allclose(out, ref_o_m, atol=2e-3, rtol=2e-3)
    assert jnp.allclose(new_h, ref_h_m, atol=2e-3, rtol=2e-3)

    # Coarse sanity vs full-f32 math (only bf16 operand rounding separates them).
    ref_o, ref_h = ref_forward_f32(inp, hidden, w_xz, w_zz, w_zx, b_z, b_x)
    assert float(jnp.max(jnp.abs(out - ref_o))) < 1.0
    assert float(jnp.max(jnp.abs(new_h - ref_h))) < 0.25

    # --- fused T-step rollout (get_prediction-style) in ONE pallas_call ---
    outs, final_h = rnn_rollout(inp, hidden, w_xz, w_zz, w_zx, b_z, b_x, T=T)
    jax.block_until_ready((outs, final_h))
    assert outs.shape == (T, B, INPUT_SIZE) and final_h.shape == (B, HIDDEN_SIZE)

    ref_outs, ref_fh = ref_rollout_matched(inp, hidden, w_xz, w_zz, w_zx, b_z, b_x, T)
    assert jnp.allclose(outs, ref_outs, atol=0.15, rtol=0.1)
    assert jnp.allclose(final_h, ref_fh, atol=0.05, rtol=0.05)

    print("KERNEL_OK")
</pallas_src>

<mosaic_0001>
module attributes {stable_mosaic.version = 11 : i64} {
  func.func @rnn_fused_kernel(%arg0: i32, %arg1: i32, %arg2: memref<8x128xf32, #tpu.memory_space<vmem>>, %arg3: memref<8x128xf32, #tpu.memory_space<vmem>>, %arg4: memref<128x128xbf16, #tpu.memory_space<vmem>>, %arg5: memref<128x128xbf16, #tpu.memory_space<vmem>>, %arg6: memref<128x128xbf16, #tpu.memory_space<vmem>>, %arg7: memref<1x128xf32, #tpu.memory_space<vmem>>, %arg8: memref<1x128xf32, #tpu.memory_space<vmem>>, %arg9: memref<1x8x128xf32, #tpu.memory_space<vmem>>, %arg10: memref<8x128xf32, #tpu.memory_space<vmem>>, %arg11: memref<8x128xf32, #tpu.memory_space<vmem>>, %arg12: memref<8x128xf32, #tpu.memory_space<vmem>>) attributes {dimension_semantics = [#tpu.dimension_semantics<parallel>, #tpu.dimension_semantics<arbitrary>], iteration_bounds = array<i64: 1, 1>, scalar_prefetch = 0 : i64, scratch_operands = 2 : i64, tpu.core_type = #tpu.core_type<tc>, window_params = [{transform_indices = @transform_0, window_bounds = array<i64: 8, 128>}, {transform_indices = @transform_1, window_bounds = array<i64: 8, 128>}, {pipeline_mode = #tpu.pipeline_mode<synchronous>, transform_indices = @transform_2, window_bounds = array<i64: 128, 128>}, {pipeline_mode = #tpu.pipeline_mode<synchronous>, transform_indices = @transform_3, window_bounds = array<i64: 128, 128>}, {pipeline_mode = #tpu.pipeline_mode<synchronous>, transform_indices = @transform_4, window_bounds = array<i64: 128, 128>}, {pipeline_mode = #tpu.pipeline_mode<synchronous>, transform_indices = @transform_5, window_bounds = array<i64: 1, 128>}, {pipeline_mode = #tpu.pipeline_mode<synchronous>, transform_indices = @transform_6, window_bounds = array<i64: 1, 128>}, {transform_indices = @transform_7, window_bounds = array<i64: 1, 8, 128>}, {transform_indices = @transform_8, window_bounds = array<i64: 8, 128>}]} {
    %c0_i32 = arith.constant 0 : i32
    %0 = arith.cmpi eq, %arg1, %c0_i32 : i32
    %1 = arith.extui %0 : i1 to i32
    %c0_i32_0 = arith.constant 0 : i32
    %2 = arith.cmpi ne, %1, %c0_i32_0 : i32
    scf.if %2 {
      %c0_25 = arith.constant 0 : index
      %c0_26 = arith.constant 0 : index
      %30 = vector.load %arg3[%c0_25, %c0_26] : memref<8x128xf32, #tpu.memory_space<vmem>>, vector<8x128xf32>
      %c0_27 = arith.constant 0 : index
      %c0_28 = arith.constant 0 : index
      %31 = vector.load %arg11[%c0_27, %c0_28] : memref<8x128xf32, #tpu.memory_space<vmem>>, vector<8x128xf32>
      tpu.vector_store %arg11[%c0_27, %c0_28], %30 {strides = array<i32>} : memref<8x128xf32, #tpu.memory_space<vmem>>, vector<8x128xf32>,
      %c0_29 = arith.constant 0 : index
      %c0_30 = arith.constant 0 : index
      %32 = vector.load %arg2[%c0_29, %c0_30] : memref<8x128xf32, #tpu.memory_space<vmem>>, vector<8x128xf32>
      %c0_31 = arith.constant 0 : index
      %c0_32 = arith.constant 0 : index
      %33 = vector.load %arg12[%c0_31, %c0_32] : memref<8x128xf32, #tpu.memory_space<vmem>>, vector<8x128xf32>
      tpu.vector_store %arg12[%c0_31, %c0_32], %32 {strides = array<i32>} : memref<8x128xf32, #tpu.memory_space<vmem>>, vector<8x128xf32>,
    } else {
    }
    %c0 = arith.constant 0 : index
    %c0_1 = arith.constant 0 : index
    %3 = vector.load %arg12[%c0, %c0_1] : memref<8x128xf32, #tpu.memory_space<vmem>>, vector<8x128xf32>
    %4 = arith.truncf %3 : vector<8x128xf32> to vector<8x128xbf16>
    %c0_2 = arith.constant 0 : index
    %c0_3 = arith.constant 0 : index
    %5 = vector.load %arg11[%c0_2, %c0_3] : memref<8x128xf32, #tpu.memory_space<vmem>>, vector<8x128xf32>
    %6 = arith.truncf %5 : vector<8x128xf32> to vector<8x128xbf16>
    %c0_4 = arith.constant 0 : index
    %c0_5 = arith.constant 0 : index
    %7 = vector.load %arg4[%c0_4, %c0_5] : memref<128x128xbf16, #tpu.memory_space<vmem>>, vector<128x128xbf16>
    %cst = arith.constant dense<0.000000e+00> : vector<8x128xf32>
    %8 = tpu.matmul %4, %7, %cst {dimension_numbers = #tpu.dot_dimension_numbers<[1], [0], [0], [1], [0, 0, 1, 1], [], []>} : vector<8x128xbf16>, vector<128x128xbf16>, vector<8x128xf32> -> vector<8x128xf32>
    %c0_6 = arith.constant 0 : index
    %c0_7 = arith.constant 0 : index
    %9 = vector.load %arg5[%c0_6, %c0_7] : memref<128x128xbf16, #tpu.memory_space<vmem>>, vector<128x128xbf16>
    %cst_8 = arith.constant dense<0.000000e+00> : vector<8x128xf32>
    %10 = tpu.matmul %6, %9, %cst_8 {dimension_numbers = #tpu.dot_dimension_numbers<[1], [0], [0], [1], [0, 0, 1, 1], [], []>} : vector<8x128xbf16>, vector<128x128xbf16>, vector<8x128xf32> -> vector<8x128xf32>
    %11 = arith.addf %8, %10 : vector<8x128xf32>
    %c0_9 = arith.constant 0 : index
    %c0_10 = arith.constant 0 : index
    %12 = vector.load %arg7[%c0_9, %c0_10] : memref<1x128xf32, #tpu.memory_space<vmem>>, vector<1x128xf32>
    %13 = vector.broadcast %12 : vector<1x128xf32> to vector<8x128xf32>
    %14 = arith.addf %11, %13 : vector<8x128xf32>
    %15 = math.tanh %14 : vector<8x128xf32>
    %16 = arith.truncf %15 : vector<8x128xf32> to vector<8x128xbf16>
    %c0_11 = arith.constant 0 : index
    %c0_12 = arith.constant 0 : index
    %17 = vector.load %arg6[%c0_11, %c0_12] : memref<128x128xbf16, #tpu.memory_space<vmem>>, vector<128x128xbf16>
    %cst_13 = arith.constant dense<0.000000e+00> : vector<8x128xf32>
    %18 = tpu.matmul %16, %17, %cst_13 {dimension_numbers = #tpu.dot_dimension_numbers<[1], [0], [0], [1], [0, 0, 1, 1], [], []>} : vector<8x128xbf16>, vector<128x128xbf16>, vector<8x128xf32> -> vector<8x128xf32>
    %c0_14 = arith.constant 0 : index
    %c0_15 = arith.constant 0 : index
    %19 = vector.load %arg8[%c0_14, %c0_15] : memref<1x128xf32, #tpu.memory_space<vmem>>, vector<1x128xf32>
    %20 = vector.broadcast %19 : vector<1x128xf32> to vector<8x128xf32>
    %21 = arith.addf %18, %20 : vector<8x128xf32>
    %c0_16 = arith.constant 0 : index
    %c0_17 = arith.constant 0 : index
    %22 = vector.load %arg11[%c0_16, %c0_17] : memref<8x128xf32, #tpu.memory_space<vmem>>, vector<8x128xf32>
    tpu.vector_store %arg11[%c0_16, %c0_17], %15 {strides = array<i32>} : memref<8x128xf32, #tpu.memory_space<vmem>>, vector<8x128xf32>,
    %c0_18 = arith.constant 0 : index
    %c0_19 = arith.constant 0 : index
    %23 = vector.load %arg12[%c0_18, %c0_19] : memref<8x128xf32, #tpu.memory_space<vmem>>, vector<8x128xf32>
    tpu.vector_store %arg12[%c0_18, %c0_19], %21 {strides = array<i32>} : memref<8x128xf32, #tpu.memory_space<vmem>>, vector<8x128xf32>,
    %c0_20 = arith.constant 0 : index
    %c0_21 = arith.constant 0 : index
    %c0_22 = arith.constant 0 : index
    %24 = vector.load %arg9[%c0_20, %c0_21, %c0_22] : memref<1x8x128xf32, #tpu.memory_space<vmem>>, vector<1x8x128xf32>
    %25 = vector.shape_cast %24 : vector<1x8x128xf32> to vector<8x128xf32>
    %26 = vector.shape_cast %21 : vector<8x128xf32> to vector<1x8x128xf32>
    tpu.vector_store %arg9[%c0_20, %c0_21, %c0_22], %26 {strides = array<i32>} : memref<1x8x128xf32, #tpu.memory_space<vmem>>, vector<1x8x128xf32>,
    %c0_i32_23 = arith.constant 0 : i32
    %27 = arith.cmpi eq, %arg1, %c0_i32_23 : i32
    %28 = arith.extui %27 : i1 to i32
    %c0_i32_24 = arith.constant 0 : i32
    %29 = arith.cmpi ne, %28, %c0_i32_24 : i32
    scf.if %29 {
      %c0_25 = arith.constant 0 : index
      %c0_26 = arith.constant 0 : index
      %30 = vector.load %arg10[%c0_25, %c0_26] : memref<8x128xf32, #tpu.memory_space<vmem>>, vector<8x128xf32>
      tpu.vector_store %arg10[%c0_25, %c0_26], %15 {strides = array<i32>} : memref<8x128xf32, #tpu.memory_space<vmem>>, vector<8x128xf32>,
    } else {
    }
    return
  }
  func.func @transform_0(%arg0: i32, %arg1: i32) -> (i32, i32) {
    %c0_i32 = arith.constant 0 : i32
    %c0_i32_0 = arith.constant 0 : i32
    return %arg0, %c0_i32 : i32, i32
  }
  func.func @transform_1(%arg0: i32, %arg1: i32) -> (i32, i32) {
    %c0_i32 = arith.constant 0 : i32
    %c0_i32_0 = arith.constant 0 : i32
    return %arg0, %c0_i32 : i32, i32
  }
  func.func @transform_2(%arg0: i32, %arg1: i32) -> (i32, i32) {
    %c0_i32 = arith.constant 0 : i32
    %c0_i32_0 = arith.constant 0 : i32
    %c0_i32_1 = arith.constant 0 : i32
    return %c0_i32, %c0_i32_0 : i32, i32
  }
  func.func @transform_3(%arg0: i32, %arg1: i32) -> (i32, i32) {
    %c0_i32 = arith.constant 0 : i32
    %c0_i32_0 = arith.constant 0 : i32
    %c0_i32_1 = arith.constant 0 : i32
    return %c0_i32, %c0_i32_0 : i32, i32
  }
  func.func @transform_4(%arg0: i32, %arg1: i32) -> (i32, i32) {
    %c0_i32 = arith.constant 0 : i32
    %c0_i32_0 = arith.constant 0 : i32
    %c0_i32_1 = arith.constant 0 : i32
    return %c0_i32, %c0_i32_0 : i32, i32
  }
  func.func @transform_5(%arg0: i32, %arg1: i32) -> (i32, i32) {
    %c0_i32 = arith.constant 0 : i32
    %c0_i32_0 = arith.constant 0 : i32
    %c0_i32_1 = arith.constant 0 : i32
    return %c0_i32, %c0_i32_0 : i32, i32
  }
  func.func @transform_6(%arg0: i32, %arg1: i32) -> (i32, i32) {
    %c0_i32 = arith.constant 0 : i32
    %c0_i32_0 = arith.constant 0 : i32
    %c0_i32_1 = arith.constant 0 : i32
    return %c0_i32, %c0_i32_0 : i32, i32
  }
  func.func @transform_7(%arg0: i32, %arg1: i32) -> (i32, i32, i32) {
    %c0_i32 = arith.constant 0 : i32
    %c0_i32_0 = arith.constant 0 : i32
    return %arg1, %arg0, %c0_i32 : i32, i32, i32
  }
  func.func @transform_8(%arg0: i32, %arg1: i32) -> (i32, i32) {
    %c0_i32 = arith.constant 0 : i32
    %c0_i32_0 = arith.constant 0 : i32
    return %arg0, %c0_i32 : i32, i32
  }
}

</mosaic_0001>

<bundles_post_ra>
// kernel: rnn_rollout.1
= control target key start
LH: loop header
LB: loop body
LE: loop exit
PB: predicated region body
PF: predicated region fallthrough
CT: control target
= control target key end

     0   :  { %v526_v0 = vmov 0.0   ;;  %vm527_vm0 = vmmov 0   ;;  %s693_s3 = inlined_call_operand.vmem [shape: bf16[128,128], index: 3, kind: input, shape index: {}]   ;;  %s694_s2 = inlined_call_operand.vmem [shape: bf16[128,128], index: 2, kind: input, shape index: {}]   ;;  %s695_s4 = inlined_call_operand.vmem [shape: bf16[128,128], index: 4, kind: input, shape index: {}]   ;;  %s696_s1 = inlined_call_operand.vmem [shape: f32[8,128], index: 1, kind: input, shape index: {}]   ;;  %s697_s0 = inlined_call_operand.vmem [shape: f32[8,128], index: 0, kind: input, shape index: {}]   ;;  %s698_s5 = inlined_call_operand.vmem [shape: f32[1,128], index: 5, kind: input, shape index: {}]   ;;  %s699_s8 = inlined_call_operand.vmem [shape: f32[8,128], index: 8, kind: output, shape index: {1}]   ;;  %s700_s6 = inlined_call_operand.vmem [shape: f32[1,128], index: 6, kind: input, shape index: {}]   ;;  %s701_s7 = inlined_call_operand.vmem [shape: f32[1,8,128], index: 7, kind: output, shape index: {0}]  }
   0x1   :  { %438 = vmatprep.subr.bf16.mxu0 %v526_v0  ;;  %458 = vmatprep.subr.bf16.mxu1 %v526_v0  ;;  %v500_v1 = vld [vmem:[%s693_s3 + $0x38] sm:$0xff]   ;;  %v502_v3 = vld [vmem:[%s693_s3 + $0x30] sm:$0xff]   ;;  %v504_v5 = vld [vmem:[%s693_s3 + $0x28] sm:$0xff]  }
   0x2   :  { %v501_v2 = vld [vmem:[%s694_s2 + $0x38] sm:$0xff]   ;;  %454 = vmatprep.mubr.msk.bf16.mxu0 %vm527_vm0, %v526_v0  ;;  %474 = vmatprep.mubr.msk.bf16.mxu1 %vm527_vm0, %v526_v0  ;;  %v503_v4 = vld [vmem:[%s694_s2 + $0x30] sm:$0xff]   ;;  %v505_v6 = vld [vmem:[%s694_s2 + $0x28] sm:$0xff]  }
   0x3   :  { %439 = vmatpush3.bf16.msra.mxu0 %v500_v1  ;;  %459 = vmatpush3.bf16.msra.mxu1 %v501_v2  ;;  %v506_v7 = vld [vmem:[%s693_s3 + $0x20] sm:$0xff]   ;;  %v508_v9 = vld [vmem:[%s693_s3 + $0x18] sm:$0xff]   ;;  %v510_v11 = vld [vmem:[%s693_s3 + $0x10] sm:$0xff]  }
   0x4   :  { %440 = vmatprep.subr.bf16.mxu0 %v526_v0  ;;  %460 = vmatprep.subr.bf16.mxu1 %v526_v0  ;;  %v507_v8 = vld [vmem:[%s694_s2 + $0x20] sm:$0xff]   ;;  %v509_v10 = vld [vmem:[%s694_s2 + $0x18] sm:$0xff]   ;;  %v511_v12 = vld [vmem:[%s694_s2 + $0x10] sm:$0xff]  }
   0x5   :  { %v512_v13 = vld [vmem:[%s693_s3 + $0x8] sm:$0xff]   ;;  %v514_v15 = vld [vmem:[%s693_s3] sm:$0xff]   ;;  %v516_v21 = vld [vmem:[%s695_s4 + $0x38] sm:$0xff]  }
   0x6   :  { %v513_v14 = vld [vmem:[%s694_s2 + $0x8] sm:$0xff]   ;;  %v33_v16 = vld [vmem:[%s696_s1] sm:$0xff]  ;;  %v517_v22 = vld [vmem:[%s695_s4 + $0x30] sm:$0xff]  }
   0x7   :  { %441 = vmatpush3.bf16.msra.mxu0 %v502_v3  ;;  %461 = vmatpush3.bf16.msra.mxu1 %v503_v4  ;;  %v515_v17 = vld [vmem:[%s694_s2] sm:$0xff]   ;;  %v40_v19 = vpack.c.bf16 %v33_v16, %v33_v16  ;;  %v518_v23 = vld [vmem:[%s695_s4 + $0x28] sm:$0xff]   ;;  %v520_v25 = vld [vmem:[%s695_s4 + $0x18] sm:$0xff]  }
   0x8   :  { %442 = vmatprep.subr.bf16.mxu0 %v526_v0  ;;  %462 = vmatprep.subr.bf16.mxu1 %v526_v0  ;;  %v35_v18 = vld [vmem:[%s697_s0] sm:$0xff]  ;;  %v521_v26 = vld [vmem:[%s695_s4 + $0x10] sm:$0xff]   ;;  %v522_v27 = vld [vmem:[%s695_s4 + $0x8] sm:$0xff]  }
   0x9   :  { %v38_v20 = vpack.c.bf16 %v35_v18, %v35_v18  ;;  %v519_v24 = vld [vmem:[%s695_s4 + $0x20] sm:$0xff]  }
   0xa   :  { %v523_v28 = vld [vmem:[%s695_s4] sm:$0xff]  }
   0xb   :  { %443 = vmatpush3.bf16.msra.mxu0 %v504_v5  ;;  %463 = vmatpush3.bf16.msra.mxu1 %v505_v6  ;;  %v401_v31 = vld [vmem:[%s698_s5] ss:$0 sm:$0xff] }
   0xc   :  { %444 = vmatprep.subr.bf16.mxu0 %v526_v0  ;;  %464 = vmatprep.subr.bf16.mxu1 %v526_v0  ;;  %v402_v42 = vld [vmem:[%s700_s6] ss:$0 sm:$0xff] }
   0xf   :  { %445 = vmatpush3.bf16.msra.mxu0 %v506_v7  ;;  %465 = vmatpush3.bf16.msra.mxu1 %v507_v8 }
  0x10   :  { %446 = vmatprep.subr.bf16.mxu0 %v526_v0  ;;  %466 = vmatprep.subr.bf16.mxu1 %v526_v0 }
  0x13   :  { %447 = vmatpush3.bf16.msra.mxu0 %v508_v9  ;;  %467 = vmatpush3.bf16.msra.mxu1 %v509_v10 }
  0x14   :  { %448 = vmatprep.subr.bf16.mxu0 %v526_v0  ;;  %468 = vmatprep.subr.bf16.mxu1 %v526_v0 }
  0x17   :  { %449 = vmatpush3.bf16.msra.mxu0 %v510_v11  ;;  %469 = vmatpush3.bf16.msra.mxu1 %v511_v12 }
  0x18   :  { %450 = vmatprep.subr.bf16.mxu0 %v526_v0  ;;  %470 = vmatprep.subr.bf16.mxu1 %v526_v0 }
  0x1b   :  { %451 = vmatpush3.bf16.msra.mxu0 %v512_v13  ;;  %471 = vmatpush3.bf16.msra.mxu1 %v513_v14 }
  0x1c   :  { %452 = vmatprep.subr.bf16.mxu0 %v526_v0  ;;  %472 = vmatprep.subr.bf16.mxu1 %v526_v0 }
  0x1f   :  { %453 = vmatpush3.bf16.msra.mxu0 %v514_v15  ;;  %473 = vmatpush3.bf16.msra.mxu1 %v515_v17 }
  0x20   :  { %478 = vmatprep.subr.bf16.mxu0 %v526_v0 }
  0x22   :  { %455 = vmatmul.mubr.bf16.vlgmr.msra.gmra.mxu0 %v40_v19  ;;  %475 = vmatmul.mubr.bf16.vlgmr.msra.gmra.mxu1 %v38_v20 }
  0x23   :  { %479 = vmatpush3.bf16.msra.mxu0 %v516_v21  ;;  %494 = vmatprep.mubr.msk.bf16.mxu0 %vm527_vm0, %v526_v0 }
  0x24   :  { %480 = vmatprep.subr.bf16.mxu0 %v526_v0 }
  0x27   :  { %481 = vmatpush3.bf16.msra.mxu0 %v517_v22 }
  0x28   :  { %482 = vmatprep.subr.bf16.mxu0 %v526_v0 }
  0x2b   :  { %483 = vmatpush3.bf16.msra.mxu0 %v518_v23 }
  0x2c   :  { %484 = vmatprep.subr.bf16.mxu0 %v526_v0 }
  0x2f   :  { %485 = vmatpush3.bf16.msra.mxu0 %v519_v24 }
  0x30   :  { %486 = vmatprep.subr.bf16.mxu0 %v526_v0 }
  0x33   :  { %487 = vmatpush3.bf16.msra.mxu0 %v520_v25 }
  0x34   :  { %488 = vmatprep.subr.bf16.mxu0 %v526_v0 }
  0x37   :  { %489 = vmatpush3.bf16.msra.mxu0 %v521_v26 }
  0x38   :  { %490 = vmatprep.subr.bf16.mxu0 %v526_v0 }
  0x3b   :  { %491 = vmatpush3.bf16.msra.mxu0 %v522_v27 }
  0x3c   :  { %492 = vmatprep.subr.bf16.mxu0 %v526_v0 }
  0x3f   :  { %493 = vmatpush3.bf16.msra.mxu0 %v523_v28 }
  0xe2   :  { %v155_v29 = vpop.f32.mrf.mxu0  ;;  %v243_v30 = vpop.f32.mrf.mxu1 }
  0xe3   :  { %v244_v32 = vadd.f32 %v243_v30, %v155_v29 }
  0xe4   :  { %v456_v33 = vpop.f32.mrf.mxu0  ;;  %v476_v34 = vpop.f32.mrf.mxu1 }
  0xe5   :  { %v256_v35 = vadd.f32 %v401_v31, %v244_v32 }
  0xe6   :  { %v158_v36 = vpop.f32.mrf.mxu0  ;;  %v246_v37 = vpop.f32.mrf.mxu1 }
  0xe7   :  { %524 = vtanh.f32 %v256_v35 }
  0xe8   :  { %v457_v38 = vpop.f32.mrf.mxu0  ;;  %v477_v39 = vpop.f32.mrf.mxu1 }
  0xf4   :  { %v525_v40 = vpop.eup %524 }
  0xf5   :  { %376 = vst [vmem:[%s699_s8] sm:$0xff] %v525_v40  ;;  %v258_v41 = vpack.c.bf16 %v525_v40, %v525_v40 }
  0xf7   :  { %495 = vmatmul.mubr.bf16.vlgmr.msra.gmra.mxu0 %v258_v41 }
 0x1b7   :  { %v364_v43 = vpop.f32.mrf.mxu0 }
 0x1b8   :  { %v365_v44 = vadd.f32 %v402_v42, %v364_v43 }
 0x1b9   :  { %v496_v45 = vpop.f32.mrf.mxu0 }
 0x1ba   :  { %372 = vst [vmem:[%s701_s7] sm:$0xff] %v365_v44 }
 0x1bb   :  { %v367_v46 = vpop.f32.mrf.mxu0 }
 0x1bd   :  { %v497_v47 = vpop.f32.mrf.mxu0 }

</bundles_post_ra>
